<compile_context>
chip_gen: v7x
topology: tpu7x:2x2x1
jax: 0.10.0
libtpu: 0.0.40
codegen_flags: <defaults>
</compile_context>

<pallas_src>
import jax
import jax.numpy as jnp
from jax.experimental import pallas as pl
from jax.experimental.pallas import tpu as pltpu


def sem_map_pooled_kernel(
    x_ref,      # [1, 2C, TB*WH]  (unshuffle ; walkthrough) stacked on sublanes
    w1_ref,     # [H+A, 3C]       fused encoder-conv1 / attention-conv1 weight
    b1_ref,     # [H+A, 1]
    w2_ref,     # [H, H]          encoder conv2 weight
    b2_ref,     # [H, 1]
    a2w_ref,    # [A, 1]          attention conv2 weight (as a column)
    a2b_ref,    # [1, 1]
    out_ref,    # [1, H, TB]
):
    x = x_ref[0]                                               # [2C, L], L=TB*WH
    c = x.shape[0] // 2
    u = x[:c]
    w = x[c:]
    # (u, w, u*w) channel concat, built once per step (sublane stack).
    stacked = jnp.concatenate([u, w, u * w], axis=0)           # [3C, L]

    # Fused first layer: encoder conv1 and attention conv1 in one MXU pass.
    h_all = jnp.dot(w1_ref[...], stacked,
                    preferred_element_type=jnp.float32) + b1_ref[...]
    h_all = jnp.maximum(h_all, 0.0)                            # [H+A, L]

    hid = w2_ref.shape[0]
    h1 = h_all[:hid]                                           # [H, L] (8-aligned slice)
    a1 = h_all[hid:]                                           # [A, L]

    # Encoder conv2 -> ReLU.
    enc = jnp.dot(w2_ref[...], h1,
                  preferred_element_type=jnp.float32) + b2_ref[...]
    enc = jnp.maximum(enc, 0.0)                                # [H, L]

    # Attention conv2 (M=1, K=A) on the VPU: broadcast multiply + sublane reduce.
    logits = jnp.sum(a1 * a2w_ref[...], axis=0, keepdims=True) + a2b_ref[...]

    # Per-batch-element softmax + attention-weighted spatial mean, segment by
    # segment along the lane axis (static unroll, slices are lane-aligned).
    tb = out_ref.shape[2]
    wh = logits.shape[-1] // tb
    cols = []
    for t in range(tb):
        lt = logits[:, t * wh:(t + 1) * wh]                    # [1, WH]
        m = jnp.max(lt, axis=-1, keepdims=True)
        p = jnp.exp(lt - m)                                    # unnormalized softmax
        d = jnp.sum(p, axis=-1, keepdims=True)                 # [1, 1]
        enc_t = enc[:, t * wh:(t + 1) * wh]                    # [H, WH]
        s = jnp.sum(enc_t * p, axis=-1, keepdims=True)         # [H, 1]  (VPU + XLU)
        # exact softmax normalization and the 1/WH spatial mean, folded together
        cols.append(s / (d * wh))
    pooled = cols[0] if tb == 1 else jnp.concatenate(cols, axis=-1)   # [H, TB]
    out_ref[0] = pooled.astype(out_ref.dtype)


def prepare_kernel_params(params):
    """One-time weight layout prep (hoisted out of the per-call hot path)."""
    w1 = jnp.concatenate([params["enc1_w"], params["att1_w"]], axis=0)  # [(H+A), 3C]
    b1 = jnp.concatenate([params["enc1_b"], params["att1_b"]]).reshape(-1, 1)
    return {
        "w1": w1,
        "b1": b1,
        "w2": params["enc2_w"],                       # [H, H]
        "b2": params["enc2_b"].reshape(-1, 1),        # [H, 1]
        "a2w": params["att2_w"].reshape(-1, 1),       # [A, 1] column for VPU path
        "a2b": params["att2_b"].reshape(1, 1),        # [1, 1]
    }


_WEIGHT_ORDER = ("w1", "b1", "w2", "b2", "a2w", "a2b")


def _pick_tb(batch, max_tb=4):
    """Largest divisor of `batch` <= max_tb (f32 vreg-pressure cap per review)."""
    tb = 1
    for cand in range(2, min(max_tb, batch) + 1):
        if batch % cand == 0:
            tb = cand
    return tb


@jax.jit
def semantic_map_2d_encoder_pooled(unshuffle, walkthrough, kp):
    """unshuffle/walkthrough: [B, C, W, H]; returns [B, hidden]."""
    b, c, wdim, hdim = unshuffle.shape
    wh = wdim * hdim
    hidden = kp["w2"].shape[0]

    tb = _pick_tb(b)                  # batch elements per grid step
    nblk = b // tb
    lanes = tb * wh

    # Channel-concat the two maps into one sublane-dense input, then block TB
    # batch elements onto the lane axis: [B/TB, 2C, TB*WH].  Tiny XLA-side
    # transpose/reshape, done once per call outside the kernel.
    u = unshuffle.reshape(b, c, wh)
    w = walkthrough.reshape(b, c, wh)
    x = jnp.concatenate([u, w], axis=1)                        # [B, 2C, WH]
    x = (x.reshape(nblk, tb, 2 * c, wh)
           .transpose(0, 2, 1, 3)
           .reshape(nblk, 2 * c, lanes))

    weights = tuple(kp[k] for k in _WEIGHT_ORDER)

    def resident_spec(arr):           # full array, same block every grid step
        return pl.BlockSpec(arr.shape, lambda i: (0,) * arr.ndim)

    in_specs = ([pl.BlockSpec((1, 2 * c, lanes), lambda i: (i, 0, 0))]
                + [resident_spec(arr) for arr in weights])

    out = pl.pallas_call(
        sem_map_pooled_kernel,
        out_shape=jax.ShapeDtypeStruct((nblk, hidden, tb), jnp.float32),
        grid=(nblk,),
        in_specs=in_specs,
        out_specs=pl.BlockSpec((1, hidden, tb), lambda i: (i, 0, 0)),
        compiler_params=pltpu.CompilerParams(
            dimension_semantics=("parallel",),   # batch blocks shard across TCs
        ),
    )(x, *weights)

    # [B/TB, H, TB] -> [B, H]   (tiny tensor, XLA-side)
    return out.transpose(0, 2, 1).reshape(b, hidden)


# --------------------------- pure-JAX reference ---------------------------
def reference(unshuffle, walkthrough, params):
    concat = jnp.concatenate(
        [unshuffle, walkthrough, unshuffle * walkthrough], axis=1)   # [B,3C,W,H]

    def conv1x1(x, wgt, bias):
        return jnp.einsum("oc,bcwh->bowh", wgt, x) + bias[None, :, None, None]

    att = jnp.maximum(conv1x1(concat, params["att1_w"], params["att1_b"]), 0.0)
    logits = conv1x1(att, params["att2_w"], params["att2_b"])        # [B,1,W,H]
    bsz = concat.shape[0]
    probs = jax.nn.softmax(logits.reshape(bsz, -1), axis=-1).reshape(logits.shape)

    enc = jnp.maximum(conv1x1(concat, params["enc1_w"], params["enc1_b"]), 0.0)
    enc = jnp.maximum(conv1x1(enc, params["enc2_w"], params["enc2_b"]), 0.0)
    return (enc * probs).mean(-1).mean(-1)                           # [B, hidden]


def init_params(key, n_map_channels, hidden_size):
    attn_dim = hidden_size // 4
    c3 = 3 * n_map_channels
    ks = jax.random.split(key, 8)
    s = 0.5
    return {
        "enc1_w": s * jax.random.normal(ks[0], (hidden_size, c3), jnp.float32),
        "enc1_b": s * jax.random.normal(ks[1], (hidden_size,), jnp.float32),
        "enc2_w": s * jax.random.normal(ks[2], (hidden_size, hidden_size), jnp.float32),
        "enc2_b": s * jax.random.normal(ks[3], (hidden_size,), jnp.float32),
        "att1_w": s * jax.random.normal(ks[4], (attn_dim, c3), jnp.float32),
        "att1_b": s * jax.random.normal(ks[5], (attn_dim,), jnp.float32),
        "att2_w": s * jax.random.normal(ks[6], (1, attn_dim), jnp.float32),
        "att2_b": s * jax.random.normal(ks[7], (1,), jnp.float32),
    }


if __name__ == "__main__":
    N_MAP_CHANNELS = 4
    HIDDEN = 32
    B, W, H = 8, 16, 16   # B=8 -> TB=4 per grid step, 2-step grid (>=2 TC blocks)

    key = jax.random.PRNGKey(0)
    k_u, k_w, k_p = jax.random.split(key, 3)
    unshuffle = jax.random.normal(k_u, (B, N_MAP_CHANNELS, W, H), jnp.float32)
    walkthrough = jax.random.normal(k_w, (B, N_MAP_CHANNELS, W, H), jnp.float32)
    params = init_params(k_p, N_MAP_CHANNELS, HIDDEN)

    # layout prep (weight fusion / reshapes) done once, outside the hot path
    kparams = prepare_kernel_params(params)

    out = semantic_map_2d_encoder_pooled(unshuffle, walkthrough, kparams)
    out = jax.block_until_ready(out)

    ref = reference(unshuffle, walkthrough, params)
    assert out.shape == (B, HIDDEN)
    assert jnp.allclose(out, ref, rtol=5e-3, atol=1e-5), (
        "mismatch vs pure-JAX reference"
    )

    print("KERNEL_OK")
</pallas_src>

<mosaic_0001>
module attributes {stable_mosaic.version = 11 : i64} {
  func.func @sem_map_pooled_kernel(%arg0: i32, %arg1: memref<1x8x1024xf32, #tpu.memory_space<vmem>>, %arg2: memref<40x12xf32, #tpu.memory_space<vmem>>, %arg3: memref<40x1xf32, #tpu.memory_space<vmem>>, %arg4: memref<32x32xf32, #tpu.memory_space<vmem>>, %arg5: memref<32x1xf32, #tpu.memory_space<vmem>>, %arg6: memref<8x1xf32, #tpu.memory_space<vmem>>, %arg7: memref<1x1xf32, #tpu.memory_space<vmem>>, %arg8: memref<1x32x4xf32, #tpu.memory_space<vmem>>) attributes {dimension_semantics = [#tpu.dimension_semantics<parallel>], iteration_bounds = array<i64: 2>, scalar_prefetch = 0 : i64, scratch_operands = 0 : i64, tpu.core_type = #tpu.core_type<tc>, window_params = [{transform_indices = @transform_0, window_bounds = array<i64: 1, 8, 1024>}, {pipeline_mode = #tpu.pipeline_mode<synchronous>, transform_indices = @transform_1, window_bounds = array<i64: 40, 12>}, {pipeline_mode = #tpu.pipeline_mode<synchronous>, transform_indices = @transform_2, window_bounds = array<i64: 40, 1>}, {pipeline_mode = #tpu.pipeline_mode<synchronous>, transform_indices = @transform_3, window_bounds = array<i64: 32, 32>}, {pipeline_mode = #tpu.pipeline_mode<synchronous>, transform_indices = @transform_4, window_bounds = array<i64: 32, 1>}, {pipeline_mode = #tpu.pipeline_mode<synchronous>, transform_indices = @transform_5, window_bounds = array<i64: 8, 1>}, {pipeline_mode = #tpu.pipeline_mode<synchronous>, transform_indices = @transform_6, window_bounds = array<i64: 1, 1>}, {transform_indices = @transform_7, window_bounds = array<i64: 1, 32, 4>}]} {
    %c0 = arith.constant 0 : index
    %c0_0 = arith.constant 0 : index
    %c0_1 = arith.constant 0 : index
    %0 = vector.load %arg1[%c0, %c0_0, %c0_1] : memref<1x8x1024xf32, #tpu.memory_space<vmem>>, vector<1x8x1024xf32>
    %1 = vector.shape_cast %0 : vector<1x8x1024xf32> to vector<8x1024xf32>
    %2 = vector.extract_strided_slice %1 {offsets = [0, 0], sizes = [4, 1024], strides = [1, 1]} : vector<8x1024xf32> to vector<4x1024xf32>
    %3 = vector.extract_strided_slice %1 {offsets = [4, 0], sizes = [4, 1024], strides = [1, 1]} : vector<8x1024xf32> to vector<4x1024xf32>
    %4 = arith.mulf %2, %3 : vector<4x1024xf32>
    %5 = tpu.concatenate %2, %3, %4 in 0 : vector<4x1024xf32>, vector<4x1024xf32>, vector<4x1024xf32> -> vector<12x1024xf32>
    %c0_2 = arith.constant 0 : index
    %c0_3 = arith.constant 0 : index
    %6 = vector.load %arg2[%c0_2, %c0_3] : memref<40x12xf32, #tpu.memory_space<vmem>>, vector<40x12xf32>
    %cst = arith.constant dense<0.000000e+00> : vector<40x1024xf32>
    %7 = tpu.matmul %6, %5, %cst {dimension_numbers = #tpu.dot_dimension_numbers<[1], [0], [0], [1], [0, 0, 1, 1], [], []>} : vector<40x12xf32>, vector<12x1024xf32>, vector<40x1024xf32> -> vector<40x1024xf32>
    %c0_4 = arith.constant 0 : index
    %c0_5 = arith.constant 0 : index
    %8 = vector.load %arg3[%c0_4, %c0_5] : memref<40x1xf32, #tpu.memory_space<vmem>>, vector<40x1xf32>
    %9 = vector.broadcast %8 : vector<40x1xf32> to vector<40x1024xf32>
    %10 = arith.addf %7, %9 : vector<40x1024xf32>
    %cst_6 = arith.constant 0.000000e+00 : f32
    %11 = vector.broadcast %cst_6 : f32 to vector<40x1024xf32>
    %12 = arith.maximumf %10, %11 : vector<40x1024xf32>
    %13 = vector.extract_strided_slice %12 {offsets = [0, 0], sizes = [32, 1024], strides = [1, 1]} : vector<40x1024xf32> to vector<32x1024xf32>
    %14 = vector.extract_strided_slice %12 {offsets = [32, 0], sizes = [8, 1024], strides = [1, 1]} : vector<40x1024xf32> to vector<8x1024xf32>
    %c0_7 = arith.constant 0 : index
    %c0_8 = arith.constant 0 : index
    %15 = vector.load %arg4[%c0_7, %c0_8] : memref<32x32xf32, #tpu.memory_space<vmem>>, vector<32x32xf32>
    %cst_9 = arith.constant dense<0.000000e+00> : vector<32x1024xf32>
    %16 = tpu.matmul %15, %13, %cst_9 {dimension_numbers = #tpu.dot_dimension_numbers<[1], [0], [0], [1], [0, 0, 1, 1], [], []>} : vector<32x32xf32>, vector<32x1024xf32>, vector<32x1024xf32> -> vector<32x1024xf32>
    %c0_10 = arith.constant 0 : index
    %c0_11 = arith.constant 0 : index
    %17 = vector.load %arg5[%c0_10, %c0_11] : memref<32x1xf32, #tpu.memory_space<vmem>>, vector<32x1xf32>
    %18 = vector.broadcast %17 : vector<32x1xf32> to vector<32x1024xf32>
    %19 = arith.addf %16, %18 : vector<32x1024xf32>
    %cst_12 = arith.constant 0.000000e+00 : f32
    %20 = vector.broadcast %cst_12 : f32 to vector<32x1024xf32>
    %21 = arith.maximumf %19, %20 : vector<32x1024xf32>
    %c0_13 = arith.constant 0 : index
    %c0_14 = arith.constant 0 : index
    %22 = vector.load %arg6[%c0_13, %c0_14] : memref<8x1xf32, #tpu.memory_space<vmem>>, vector<8x1xf32>
    %23 = vector.broadcast %22 : vector<8x1xf32> to vector<8x1024xf32>
    %24 = arith.mulf %14, %23 : vector<8x1024xf32>
    %cst_15 = arith.constant dense<0.000000e+00> : vector<1024xf32>
    %25 = vector.multi_reduction <add>, %24, %cst_15 [0] : vector<8x1024xf32> to vector<1024xf32>
    %26 = vector.shape_cast %25 : vector<1024xf32> to vector<1x1024xf32>
    %c0_16 = arith.constant 0 : index
    %c0_17 = arith.constant 0 : index
    %27 = vector.load %arg7[%c0_16, %c0_17] : memref<1x1xf32, #tpu.memory_space<vmem>>, vector<1x1xf32>
    %28 = vector.broadcast %27 : vector<1x1xf32> to vector<1x1024xf32>
    %29 = arith.addf %26, %28 : vector<1x1024xf32>
    %30 = vector.extract_strided_slice %29 {offsets = [0, 0], sizes = [1, 256], strides = [1, 1]} : vector<1x1024xf32> to vector<1x256xf32>
    %cst_18 = arith.constant dense<0xFF800000> : vector<1xf32>
    %31 = vector.multi_reduction <maximumf>, %30, %cst_18 [1] : vector<1x256xf32> to vector<1xf32>
    %32 = vector.shape_cast %31 : vector<1xf32> to vector<1x1xf32>
    %33 = vector.broadcast %32 : vector<1x1xf32> to vector<1x256xf32>
    %34 = arith.subf %30, %33 : vector<1x256xf32>
    %35 = math.exp %34 : vector<1x256xf32>
    %cst_19 = arith.constant dense<0.000000e+00> : vector<1xf32>
    %36 = vector.multi_reduction <add>, %35, %cst_19 [1] : vector<1x256xf32> to vector<1xf32>
    %37 = vector.shape_cast %36 : vector<1xf32> to vector<1x1xf32>
    %38 = vector.extract_strided_slice %21 {offsets = [0, 0], sizes = [32, 256], strides = [1, 1]} : vector<32x1024xf32> to vector<32x256xf32>
    %39 = vector.broadcast %35 : vector<1x256xf32> to vector<32x256xf32>
    %40 = arith.mulf %38, %39 : vector<32x256xf32>
    %cst_20 = arith.constant dense<0.000000e+00> : vector<32xf32>
    %41 = vector.multi_reduction <add>, %40, %cst_20 [1] : vector<32x256xf32> to vector<32xf32>
    %42 = vector.shape_cast %41 : vector<32xf32> to vector<32x1xf32>
    %cst_21 = arith.constant 2.560000e+02 : f32
    %43 = vector.broadcast %cst_21 : f32 to vector<1x1xf32>
    %44 = arith.mulf %37, %43 : vector<1x1xf32>
    %45 = vector.broadcast %44 : vector<1x1xf32> to vector<32x1xf32>
    %46 = arith.divf %42, %45 : vector<32x1xf32>
    %47 = vector.extract_strided_slice %29 {offsets = [0, 256], sizes = [1, 256], strides = [1, 1]} : vector<1x1024xf32> to vector<1x256xf32>
    %cst_22 = arith.constant dense<0xFF800000> : vector<1xf32>
    %48 = vector.multi_reduction <maximumf>, %47, %cst_22 [1] : vector<1x256xf32> to vector<1xf32>
    %49 = vector.shape_cast %48 : vector<1xf32> to vector<1x1xf32>
    %50 = vector.broadcast %49 : vector<1x1xf32> to vector<1x256xf32>
    %51 = arith.subf %47, %50 : vector<1x256xf32>
    %52 = math.exp %51 : vector<1x256xf32>
    %cst_23 = arith.constant dense<0.000000e+00> : vector<1xf32>
    %53 = vector.multi_reduction <add>, %52, %cst_23 [1] : vector<1x256xf32> to vector<1xf32>
    %54 = vector.shape_cast %53 : vector<1xf32> to vector<1x1xf32>
    %55 = vector.extract_strided_slice %21 {offsets = [0, 256], sizes = [32, 256], strides = [1, 1]} : vector<32x1024xf32> to vector<32x256xf32>
    %56 = vector.broadcast %52 : vector<1x256xf32> to vector<32x256xf32>
    %57 = arith.mulf %55, %56 : vector<32x256xf32>
    %cst_24 = arith.constant dense<0.000000e+00> : vector<32xf32>
    %58 = vector.multi_reduction <add>, %57, %cst_24 [1] : vector<32x256xf32> to vector<32xf32>
    %59 = vector.shape_cast %58 : vector<32xf32> to vector<32x1xf32>
    %cst_25 = arith.constant 2.560000e+02 : f32
    %60 = vector.broadcast %cst_25 : f32 to vector<1x1xf32>
    %61 = arith.mulf %54, %60 : vector<1x1xf32>
    %62 = vector.broadcast %61 : vector<1x1xf32> to vector<32x1xf32>
    %63 = arith.divf %59, %62 : vector<32x1xf32>
    %64 = vector.extract_strided_slice %29 {offsets = [0, 512], sizes = [1, 256], strides = [1, 1]} : vector<1x1024xf32> to vector<1x256xf32>
    %cst_26 = arith.constant dense<0xFF800000> : vector<1xf32>
    %65 = vector.multi_reduction <maximumf>, %64, %cst_26 [1] : vector<1x256xf32> to vector<1xf32>
    %66 = vector.shape_cast %65 : vector<1xf32> to vector<1x1xf32>
    %67 = vector.broadcast %66 : vector<1x1xf32> to vector<1x256xf32>
    %68 = arith.subf %64, %67 : vector<1x256xf32>
    %69 = math.exp %68 : vector<1x256xf32>
    %cst_27 = arith.constant dense<0.000000e+00> : vector<1xf32>
    %70 = vector.multi_reduction <add>, %69, %cst_27 [1] : vector<1x256xf32> to vector<1xf32>
    %71 = vector.shape_cast %70 : vector<1xf32> to vector<1x1xf32>
    %72 = vector.extract_strided_slice %21 {offsets = [0, 512], sizes = [32, 256], strides = [1, 1]} : vector<32x1024xf32> to vector<32x256xf32>
    %73 = vector.broadcast %69 : vector<1x256xf32> to vector<32x256xf32>
    %74 = arith.mulf %72, %73 : vector<32x256xf32>
    %cst_28 = arith.constant dense<0.000000e+00> : vector<32xf32>
    %75 = vector.multi_reduction <add>, %74, %cst_28 [1] : vector<32x256xf32> to vector<32xf32>
    %76 = vector.shape_cast %75 : vector<32xf32> to vector<32x1xf32>
    %cst_29 = arith.constant 2.560000e+02 : f32
    %77 = vector.broadcast %cst_29 : f32 to vector<1x1xf32>
    %78 = arith.mulf %71, %77 : vector<1x1xf32>
    %79 = vector.broadcast %78 : vector<1x1xf32> to vector<32x1xf32>
    %80 = arith.divf %76, %79 : vector<32x1xf32>
    %81 = vector.extract_strided_slice %29 {offsets = [0, 768], sizes = [1, 256], strides = [1, 1]} : vector<1x1024xf32> to vector<1x256xf32>
    %cst_30 = arith.constant dense<0xFF800000> : vector<1xf32>
    %82 = vector.multi_reduction <maximumf>, %81, %cst_30 [1] : vector<1x256xf32> to vector<1xf32>
    %83 = vector.shape_cast %82 : vector<1xf32> to vector<1x1xf32>
    %84 = vector.broadcast %83 : vector<1x1xf32> to vector<1x256xf32>
    %85 = arith.subf %81, %84 : vector<1x256xf32>
    %86 = math.exp %85 : vector<1x256xf32>
    %cst_31 = arith.constant dense<0.000000e+00> : vector<1xf32>
    %87 = vector.multi_reduction <add>, %86, %cst_31 [1] : vector<1x256xf32> to vector<1xf32>
    %88 = vector.shape_cast %87 : vector<1xf32> to vector<1x1xf32>
    %89 = vector.extract_strided_slice %21 {offsets = [0, 768], sizes = [32, 256], strides = [1, 1]} : vector<32x1024xf32> to vector<32x256xf32>
    %90 = vector.broadcast %86 : vector<1x256xf32> to vector<32x256xf32>
    %91 = arith.mulf %89, %90 : vector<32x256xf32>
    %cst_32 = arith.constant dense<0.000000e+00> : vector<32xf32>
    %92 = vector.multi_reduction <add>, %91, %cst_32 [1] : vector<32x256xf32> to vector<32xf32>
    %93 = vector.shape_cast %92 : vector<32xf32> to vector<32x1xf32>
    %cst_33 = arith.constant 2.560000e+02 : f32
    %94 = vector.broadcast %cst_33 : f32 to vector<1x1xf32>
    %95 = arith.mulf %88, %94 : vector<1x1xf32>
    %96 = vector.broadcast %95 : vector<1x1xf32> to vector<32x1xf32>
    %97 = arith.divf %93, %96 : vector<32x1xf32>
    %98 = tpu.concatenate %46, %63, %80, %97 in 1 : vector<32x1xf32>, vector<32x1xf32>, vector<32x1xf32>, vector<32x1xf32> -> vector<32x4xf32>
    %c0_34 = arith.constant 0 : index
    %c0_35 = arith.constant 0 : index
    %c0_36 = arith.constant 0 : index
    %99 = vector.load %arg8[%c0_34, %c0_35, %c0_36] : memref<1x32x4xf32, #tpu.memory_space<vmem>>, vector<1x32x4xf32>
    %100 = vector.shape_cast %99 : vector<1x32x4xf32> to vector<32x4xf32>
    %101 = vector.shape_cast %98 : vector<32x4xf32> to vector<1x32x4xf32>
    tpu.vector_store %arg8[%c0_34, %c0_35, %c0_36], %101 {strides = array<i32>} : memref<1x32x4xf32, #tpu.memory_space<vmem>>, vector<1x32x4xf32>,
    return
  }
  func.func @transform_0(%arg0: i32) -> (i32, i32, i32) {
    %c0_i32 = arith.constant 0 : i32
    %c0_i32_0 = arith.constant 0 : i32
    %c0_i32_1 = arith.constant 0 : i32
    return %arg0, %c0_i32, %c0_i32_0 : i32, i32, i32
  }
  func.func @transform_1(%arg0: i32) -> (i32, i32) {
    %c0_i32 = arith.constant 0 : i32
    %c0_i32_0 = arith.constant 0 : i32
    %c0_i32_1 = arith.constant 0 : i32
    return %c0_i32, %c0_i32_0 : i32, i32
  }
  func.func @transform_2(%arg0: i32) -> (i32, i32) {
    %c0_i32 = arith.constant 0 : i32
    %c0_i32_0 = arith.constant 0 : i32
    %c0_i32_1 = arith.constant 0 : i32
    return %c0_i32, %c0_i32_0 : i32, i32
  }
  func.func @transform_3(%arg0: i32) -> (i32, i32) {
    %c0_i32 = arith.constant 0 : i32
    %c0_i32_0 = arith.constant 0 : i32
    %c0_i32_1 = arith.constant 0 : i32
    return %c0_i32, %c0_i32_0 : i32, i32
  }
  func.func @transform_4(%arg0: i32) -> (i32, i32) {
    %c0_i32 = arith.constant 0 : i32
    %c0_i32_0 = arith.constant 0 : i32
    %c0_i32_1 = arith.constant 0 : i32
    return %c0_i32, %c0_i32_0 : i32, i32
  }
  func.func @transform_5(%arg0: i32) -> (i32, i32) {
    %c0_i32 = arith.constant 0 : i32
    %c0_i32_0 = arith.constant 0 : i32
    %c0_i32_1 = arith.constant 0 : i32
    return %c0_i32, %c0_i32_0 : i32, i32
  }
  func.func @transform_6(%arg0: i32) -> (i32, i32) {
    %c0_i32 = arith.constant 0 : i32
    %c0_i32_0 = arith.constant 0 : i32
    %c0_i32_1 = arith.constant 0 : i32
    return %c0_i32, %c0_i32_0 : i32, i32
  }
  func.func @transform_7(%arg0: i32) -> (i32, i32, i32) {
    %c0_i32 = arith.constant 0 : i32
    %c0_i32_0 = arith.constant 0 : i32
    %c0_i32_1 = arith.constant 0 : i32
    return %arg0, %c0_i32, %c0_i32_0 : i32, i32, i32
  }
}

</mosaic_0001>

<bundles_post_ra>
// kernel: semantic_map_2d_encoder_pooled.1
= control target key start
LH: loop header
LB: loop body
LE: loop exit
PB: predicated region body
PF: predicated region fallthrough
CT: control target
= control target key end

     0   :  { %s1757_s26 = smov 0   ;;  %s2165_s0 = inlined_call_operand.vmem [shape: f32[2,8,1024], index: 0, kind: input, shape index: {}]   ;;  %s2166_s1 = inlined_call_operand.vmem [shape: f32[40,12], index: 1, kind: input, shape index: {}]   ;;  %s2167_s2 = inlined_call_operand.vmem [shape: f32[40,1], index: 2, kind: input, shape index: {}]   ;;  %s2168_s3 = inlined_call_operand.vmem [shape: f32[32,32], index: 3, kind: input, shape index: {}]   ;;  %s2169_s4 = inlined_call_operand.vmem [shape: f32[32,1], index: 4, kind: input, shape index: {}]   ;;  %s2170_s5 = inlined_call_operand.vmem [shape: f32[8,1], index: 5, kind: input, shape index: {}]   ;;  %s2171_s6 = inlined_call_operand.<no memory space> [shape: f32[1,1], index: 6, kind: input, shape index: {}]   ;;  %s2172_s7 = inlined_call_operand.vmem [shape: f32[2,32,4], index: 7, kind: output, shape index: {}]  }
   0x1   :  { %v12_v0 = vstv %s2171_s6 }
   0x2   :  { %13 = vst [vmem:[#allocation2] sm:$0x1] %v12_v0 }
   0x3 LB: > { %s1553_s27 = sadd.s32 4294967295, %s1709_s26   ;;  %p1557_p0 = scmp.ge.s32.totalorder %s1709_s26, 1  ;;  %s1709_s26 = sphi %s1757_s26, %s19_s26  }
   0x4   : > { %p239_p1 = scmp.lt.s32.totalorder %s1709_s26, 3 }
   0x6   : > { %p240_p2 = pnand %p1557_p0, %p239_p1 }
   0x7   : > { %p271_p3 = scmp.lt.s32.totalorder (!%p240_p2), %s1553_s27, 1  ;;  %v1711_v1 = vmov (!%p240_p2), 0.0   ;;  %v1712_v2 = vmov (!%p240_p2), 0   ;;  %v326_v3 = vld [vmem:[%s2167_s2] sm:$0xff] (!%p240_p2)  ;;  %v327_v4 = vld [vmem:[%s2167_s2 + $0x8] sm:$0xff] (!%p240_p2)  ;;  %v328_v5 = vld [vmem:[%s2167_s2 + $0x10] sm:$0xff] (!%p240_p2)  ;;  %v1314_v26 = vlaneseq (!%p240_p2) }
   0x8   : > { %243 = sbr.rel (%p240_p2) target bundleno = 667 (0x29b), region = 48  ;;  %461 = vmatprep.mubr.f32.mxu0 (!%p240_p2), %v1711_v1  ;;  %556 = vmatprep.mubr.f32.mxu1 (!%p240_p2), %v1711_v1  ;;  %v329_v6 = vld [vmem:[%s2167_s2 + $0x18] sm:$0xff] (!%p240_p2)  ;;  %vm372_vm0 = vcmask (!%p240_p2), 1043456   ;;  %v330_v21 = vld [vmem:[%s2167_s2 + $0x20] sm:$0xff] (!%p240_p2)  ;;  %vm1713_vm1 = vmmov (!%p240_p2), 1   ;;  %vm356_vm3 = vcmask (!%p240_p2), 97280  }
   0x9   : > { %1677 = vset.pattern.permute.xlu0 (!%p240_p2), %v1712_v2  ;;  %1678 = vset.pattern.permute.xlu1 (!%p240_p2), %v1712_v2  ;;  %vm1789_vm2 = vmpackc.low (!%p240_p2), %vm372_vm0, %vm1713_vm1  ;;  %v1308_v39 = vld [vmem:[#allocation2] sm:$0x1] (!%p240_p2)  ;;  %v822_v45 = vld [vmem:[%s2169_s4 + $0x8] sm:$0xff] (!%p240_p2)  ;;  %vm845_vm4 = vcmask (!%p240_p2), 261120   ;;  %vm1478_vm5 = vcmask (!%p240_p2), 7168   ;;  %vm1483_vm6 = vcmask (!%p240_p2), 15360  }
   0xa   : > { %333 = vperm.xlu0 (!%p240_p2), %1677, %v326_v3   ;;  %343 = vperm.xlu1 (!%p240_p2), %1678, %v328_v5   ;;  %v1246_v40 = vld [vmem:[%s2170_s5] sm:$0xff] (!%p240_p2)  ;;  %v322_v46 = vld [vmem:[%s2166_s1 + $0x8] sm:$0xff] (!%p240_p2)  ;;  %v323_v47 = vld [vmem:[%s2166_s1 + $0x10] sm:$0xff] (!%p240_p2)  ;;  %vm1488_vm7 = vcmask (!%p240_p2), 23552   ;;  %vm1493_vm8 = vcmask (!%p240_p2), 31744  }
   0xb   : > { %v321_v41 = vld [vmem:[%s2166_s1] sm:$0xff] (!%p240_p2)  ;;  %v324_v48 = vld [vmem:[%s2166_s1 + $0x18] sm:$0xff] (!%p240_p2) }
   0xc   : > { %v821_v44 = vld [vmem:[%s2169_s4] sm:$0xff] (!%p240_p2) }
   0xd   : > { %v325_v49 = vld [vmem:[%s2166_s1 + $0x20] sm:$0xff] (!%p240_p2) }
   0xe   : > { %338 = vperm.xlu0 (!%p240_p2), %1677, %v327_v4   ;;  %348 = vperm.xlu1 (!%p240_p2), %1678, %v329_v6  }
   0xf   : > { %s2176_s27 = smov (!%p271_p3, %s1553_s27), 1 }
  0x10   : > { %s1608_s29 = sshll.u32 %s2176_s27, 6  ;;  %s1609_s24 = sshll.u32 %s2176_s27, 5 }
  0x11   : > { %s275_s13 = scalar_lea.vmem %s2165_s0, %s1608_s29  ;;  %s2141_s28 = scalar_lea.vmem %s2172_s7, %s1609_s24 }
  0x12   : > { %v282_v7 = vld [vmem:[%s275_s13 + $0x8] sm:$0xff]  ;;  %v284_v8 = vld [vmem:[%s275_s13 + $0x18] sm:$0xff]  ;;  %v281_v9 = vld [vmem:[%s275_s13] sm:$0xff]  ;;  %353 = vperm.xlu0 %1677, %v330_v21   ;;  %1249 = vperm.xlu1 %1678, %v1246_v40  }
  0x13   : > { %v298_v10 = vrot.slane %v282_v7, 4  ;;  %v300_v11 = vrot.slane %v284_v8, 4  ;;  %v297_v12 = vrot.slane %v281_v9, 4  ;;  %v283_v13 = vld [vmem:[%s275_s13 + $0x10] sm:$0xff]  ;;  %v286_v14 = vld [vmem:[%s275_s13 + $0x28] sm:$0xff]  ;;  %v285_v15 = vld [vmem:[%s275_s13 + $0x20] sm:$0xff] }
  0x14   : > { %v299_v16 = vrot.slane %v283_v13, 4  ;;  %v302_v17 = vrot.slane %v286_v14, 4  ;;  %v301_v18 = vrot.slane %v285_v15, 4  ;;  %v288_v19 = vld [vmem:[%s275_s13 + $0x38] sm:$0xff]  ;;  %v287_v20 = vld [vmem:[%s275_s13 + $0x30] sm:$0xff] }
  0x15   : > { %v314_v22 = vmul.f32 %v298_v10, %v282_v7  ;;  %v316_v23 = vmul.f32 %v300_v11, %v284_v8  ;;  %v313_v24 = vmul.f32 %v297_v12, %v281_v9  ;;  %v304_v25 = vrot.slane %v288_v19, 4 }
  0x16   : > { %v315_v27 = vmul.f32 %v299_v16, %v283_v13  ;;  %v318_v28 = vmul.f32 %v302_v17, %v286_v14  ;;  %v317_v29 = vmul.f32 %v301_v18, %v285_v15  ;;  %v303_v30 = vrot.slane %v287_v20, 4  ;;  %1311 = vperm.xlu0 %1677, %v1308_v39   ;;  %832 = vperm.xlu1 %1678, %v822_v45  }
  0x17   : > { %v1610_v31 = vpack.c.bf16 %v314_v22, %v282_v7  ;;  %v1616_v32 = vpack.c.bf16 %v316_v23, %v284_v8  ;;  %v1613_v33 = vpack.c.bf16 %v313_v24, %v281_v9  ;;  %v320_v34 = vmul.f32 %v304_v25, %v288_v19 }
  0x18   : > { %v1619_v35 = vpack.c.bf16 %v315_v27, %v283_v13  ;;  %v1622_v36 = vpack.c.bf16 %v318_v28, %v286_v14  ;;  %v319_v37 = vmul.f32 %v303_v30, %v287_v20  ;;  %v1625_v42 = vpack.c.bf16 %v317_v29, %v285_v15 }
  0x19   : > { %1612 = vmatprep.subr.msk.bf16.mxu0 %vm1789_vm2, %v1610_v31  ;;  %1618 = vmatprep.subr.msk.bf16.mxu1 %vm1789_vm2, %v1616_v32  ;;  %v1628_v38 = vpack.c.bf16 %v320_v34, %v288_v19 }
  0x1a   : > { %1615 = vmatpush1.bf16.msk.msra.mxu0 %vm1789_vm2, %v1613_v33  ;;  %1621 = vmatpush1.bf16.msk.msra.mxu1 %vm1789_vm2, %v1619_v35  ;;  %v1631_v43 = vpack.c.bf16 %v319_v37, %v287_v20 }
  0x1b   : > { %1624 = vmatprep.subr.msk.bf16.mxu0 %vm1789_vm2, %v1622_v36  ;;  %1630 = vmatprep.subr.msk.bf16.mxu1 %vm1789_vm2, %v1628_v38 }
  0x1c   : > { %827 = vperm.xlu0 %1677, %v821_v44  }
  0x1d   : > { %1564 = vmatmul.mubr.msk.f32.vlgmr.msra.gmra.mrb[0].mxu0 %vm356_vm3, %v321_v41  ;;  %1571 = vmatmul.mubr.msk.f32.vlgmr.msra.gmra.mrb[0].mxu1 %vm356_vm3, %v321_v41 }
  0x1e   : > { %467 = vmatprep.mubr.f32.mxu0 %v1711_v1  ;;  %562 = vmatprep.mubr.f32.mxu1 %v1711_v1 }
  0x1f   : > { %1627 = vmatpush1.bf16.msk.msra.mxu0 %vm1789_vm2, %v1625_v42  ;;  %1633 = vmatpush1.bf16.msk.msra.mxu1 %vm1789_vm2, %v1631_v43  ;;  %v1899_v42 = vshrl.u32 %v1314_v26, 7 }
  0x21   : > { %1565 = vmatmul.mubr.msk.f32.gmra.mrb[2].mxu0 %vm356_vm3, %v322_v46  ;;  %1572 = vmatmul.mubr.msk.f32.gmra.mrb[2].mxu1 %vm356_vm3, %v322_v46 }
  0x22   : > { %473 = vmatprep.mubr.f32.mxu0 %v1711_v1  ;;  %568 = vmatprep.mubr.f32.mxu1 %v1711_v1 }
  0x25   : > { %1566 = vmatmul.mubr.msk.f32.gmra.mrb[4].mxu0 %vm356_vm3, %v323_v47  ;;  %1573 = vmatmul.mubr.msk.f32.gmra.mrb[4].mxu1 %vm356_vm3, %v323_v47 }
  0x26   : > { %479 = vmatprep.mubr.f32.mxu0 %v1711_v1  ;;  %574 = vmatprep.mubr.f32.mxu1 %v1711_v1 }
  0x29   : > { %1567 = vmatmul.mubr.msk.f32.gmra.mrb[6].mxu0 %vm356_vm3, %v324_v48  ;;  %1574 = vmatmul.mubr.msk.f32.gmra.mrb[6].mxu1 %vm356_vm3, %v324_v48 }
  0x2a   : > { %485 = vmatprep.mubr.f32.mxu0 %v1711_v1  ;;  %580 = vmatprep.mubr.f32.mxu1 %v1711_v1 }
  0x2d   : > { %1568 = vmatmul.mubr.msk.f32.gmra.mrb[8].mxu0 %vm356_vm3, %v325_v49  ;;  %1575 = vmatmul.mubr.msk.f32.gmra.mrb[8].mxu1 %vm356_vm3, %v325_v49 }
  0x2e   : > { %651 = vmatprep.mubr.f32.mxu0 %v1711_v1  ;;  %746 = vmatprep.mubr.f32.mxu1 %v1711_v1 }
  0x31   : > { %1578 = vmatmul.mubr.msk.f32.vlgmr.msra.gmra.mrb[10].mxu0 %vm356_vm3, %v321_v41  ;;  %1585 = vmatmul.mubr.msk.f32.vlgmr.msra.gmra.mrb[10].mxu1 %vm356_vm3, %v321_v41 }
  0x32   : > { %657 = vmatprep.mubr.f32.mxu0 %v1711_v1  ;;  %752 = vmatprep.mubr.f32.mxu1 %v1711_v1 }
  0x35   : > { %1579 = vmatmul.mubr.msk.f32.gmra.mrb[12].mxu0 %vm356_vm3, %v322_v46  ;;  %1586 = vmatmul.mubr.msk.f32.gmra.mrb[12].mxu1 %vm356_vm3, %v322_v46 }
  0x36   : > { %663 = vmatprep.mubr.f32.mxu0 %v1711_v1  ;;  %758 = vmatprep.mubr.f32.mxu1 %v1711_v1 }
  0x39   : > { %1580 = vmatmul.mubr.msk.f32.gmra.mrb[14].mxu0 %vm356_vm3, %v323_v47  ;;  %1587 = vmatmul.mubr.msk.f32.gmra.mrb[14].mxu1 %vm356_vm3, %v323_v47 }
  0x3a   : > { %669 = vmatprep.mubr.f32.mxu0 %v1711_v1  ;;  %764 = vmatprep.mubr.f32.mxu1 %v1711_v1 }
  0x3d   : > { %1581 = vmatmul.mubr.msk.f32.gmra.mrb[16].mxu0 %vm356_vm3, %v324_v48  ;;  %1588 = vmatmul.mubr.msk.f32.gmra.mrb[16].mxu1 %vm356_vm3, %v324_v48 }
  0x3e   : > { %675 = vmatprep.mubr.f32.mxu0 %v1711_v1  ;;  %770 = vmatprep.mubr.f32.mxu1 %v1711_v1 }
  0x41   : > { %1582 = vmatmul.mubr.msk.f32.gmra.mrb[18].mxu0 %vm356_vm3, %v325_v49  ;;  %1589 = vmatmul.mubr.msk.f32.gmra.mrb[18].mxu1 %vm356_vm3, %v325_v49 }
  0x42   : > { %922 = vmatprep.mubr.f32.mxu0 %v1711_v1  ;;  %1011 = vmatprep.mubr.f32.mxu1 %v1711_v1 }
  0x89   : > { %v1873_v50 = vpop.permute.xlu0 %333  ;;  %v1879_v58 = vpop.permute.xlu1 %343 }
  0x8d   : > { %v1877_v57 = vpop.permute.xlu0 %338  ;;  %v1889_v24 = vpop.permute.xlu1 %348 }
  0x91   : > { %v1897_v38 = vpop.permute.xlu0 %353 }
  0xf0   : > { %v463_v51 = vpop.f32.mrb[0].mxu0  ;;  %v558_v52 = vpop.f32.mrb[0].mxu1 }
  0xf1   : > { %v559_v53 = vadd.f32 %v558_v52, %v1873_v50  ;;  %v465_v54 = vpop.f32.mrb[1].mxu0  ;;  %v560_v55 = vpop.f32.mrb[1].mxu1  ;;  %v464_v59 = vadd.f32 %v463_v51, %v1873_v50 }
  0xf2   : > { %v561_v56 = vadd.f32 %v560_v55, %v1873_v50  ;;  %v466_v60 = vadd.f32 %v465_v54, %v1873_v50 }
  0xf3   : > { %v779_v63 = vmax.f32 %v559_v53, 0.0  ;;  %v777_v8 = vmax.f32 %v464_v59, 0.0 }
  0xf4   : > { %v469_v61 = vpop.f32.mrb[2].mxu0  ;;  %v564_v62 = vpop.f32.mrb[2].mxu1  ;;  %v780_v5 = vmax.f32 %v561_v56, 0.0  ;;  %v778_v11 = vmax.f32 %v466_v60, 0.0 }
  0xf5   : > { %v470_v0 = vadd.f32 %v469_v61, %v1877_v57  ;;  %v565_v2 = vadd.f32 %v564_v62, %v1877_v57  ;;  %v471_v3 = vpop.f32.mrb[3].mxu0  ;;  %v566_v4 = vpop.f32.mrb[3].mxu1 }
  0xf6   : > { %v472_v6 = vadd.f32 %v471_v3, %v1877_v57  ;;  %v567_v7 = vadd.f32 %v566_v4, %v1877_v57  ;;  %v1905_v61 = vpop.permute.xlu1 %1249 }
  0xf7   : > { %v785_v9 = vmax.f32 %v470_v0, 0.0  ;;  %v787_v10 = vmax.f32 %v565_v2, 0.0  ;;  %v1316_v0 = vsub.s32 0, %v1899_v42 }
  0xf8   : > { %v786_v12 = vmax.f32 %v472_v6, 0.0  ;;  %v788_v13 = vmax.f32 %v567_v7, 0.0  ;;  %v475_v14 = vpop.f32.mrb[4].mxu0  ;;  %v570_v15 = vpop.f32.mrb[4].mxu1 }
  0xf9   : > { %v1636_v16 = vpack.c.bf16 %v785_v9, %v777_v8  ;;  %v1644_v17 = vpack.c.bf16 %v787_v10, %v779_v63  ;;  %v477_v18 = vpop.f32.mrb[5].mxu0  ;;  %v571_v19 = vadd.f32 %v570_v15, %v1879_v58  ;;  %v572_v20 = vpop.f32.mrb[5].mxu1  ;;  %v476_v25 = vadd.f32 %v475_v14, %v1879_v58 }
  0xfa   : > { %v1634_v21 = vpack.c.bf16 %v786_v12, %v778_v11  ;;  %v1642_v22 = vpack.c.bf16 %v788_v13, %v780_v5  ;;  %v573_v23 = vadd.f32 %v572_v20, %v1879_v58  ;;  %v478_v27 = vadd.f32 %v477_v18, %v1879_v58  ;;  %v1915_v12 = vld [vmem:[%s2168_s3] sm:$0xff] }
  0xfb   : > { %v795_v30 = vmax.f32 %v571_v19, 0.0  ;;  %v793_v39 = vmax.f32 %v476_v25, 0.0 }
  0xfc   : > { %v481_v28 = vpop.f32.mrb[6].mxu0  ;;  %v576_v29 = vpop.f32.mrb[6].mxu1  ;;  %1635 = vmatprep.subr.bf16.mxu0 %v1634_v21  ;;  %1643 = vmatprep.subr.bf16.mxu1 %v1642_v22  ;;  %v796_v35 = vmax.f32 %v573_v23, 0.0  ;;  %v794_v43 = vmax.f32 %v478_v27, 0.0 }
  0xfd   : > { %v482_v31 = vadd.f32 %v481_v28, %v1889_v24  ;;  %v577_v32 = vadd.f32 %v576_v29, %v1889_v24  ;;  %v483_v33 = vpop.f32.mrb[7].mxu0  ;;  %v578_v34 = vpop.f32.mrb[7].mxu1  ;;  %1637 = vmatpush1.bf16.msra.mxu0 %v1636_v16  ;;  %1645 = vmatpush1.bf16.msra.mxu1 %v1644_v17 }
  0xfe   : > { %v484_v36 = vadd.f32 %v483_v33, %v1889_v24  ;;  %v579_v37 = vadd.f32 %v578_v34, %v1889_v24  ;;  %v1930_v33 = vld [vmem:[%s2168_s3 + $0x8] sm:$0xff] }
  0xff   : > { %v801_v40 = vmax.f32 %v482_v31, 0.0  ;;  %v803_v41 = vmax.f32 %v577_v32, 0.0 }
 0x100   : > { %v802_v44 = vmax.f32 %v484_v36, 0.0  ;;  %v804_v45 = vmax.f32 %v579_v37, 0.0  ;;  %v487_v46 = vpop.f32.mrb[8].mxu0  ;;  %v582_v47 = vpop.f32.mrb[8].mxu1 }
 0x101   : > { %v1640_v48 = vpack.c.bf16 %v801_v40, %v793_v39  ;;  %v1648_v49 = vpack.c.bf16 %v803_v41, %v795_v30  ;;  %v488_v51 = vadd.f32 %v487_v46, %v1897_v38  ;;  %v583_v52 = vadd.f32 %v582_v47, %v1897_v38  ;;  %v489_v53 = vpop.f32.mrb[9].mxu0  ;;  %v584_v54 = vpop.f32.mrb[9].mxu1 }
 0x102   : > { %v1638_v55 = vpack.c.bf16 %v802_v44, %v794_v43  ;;  %v1646_v56 = vpack.c.bf16 %v804_v45, %v796_v35  ;;  %v490_v59 = vadd.f32 %v489_v53, %v1897_v38  ;;  %v585_v60 = vadd.f32 %v584_v54, %v1897_v38 }
 0x103   : > { %v809_v62 = vmax.f32 %v488_v51, 0.0  ;;  %v811_v63 = vmax.f32 %v583_v52, 0.0 }
 0x104   : > { %v810_v2 = vmax.f32 %v490_v59, 0.0  ;;  %v812_v3 = vmax.f32 %v585_v60, 0.0  ;;  %v653_v4 = vpop.f32.mrb[10].mxu0  ;;  %v748_v5 = vpop.f32.mrb[10].mxu1  ;;  %1639 = vmatprep.subr.bf16.mxu0 %v1638_v55  ;;  %1647 = vmatprep.subr.bf16.mxu1 %v1646_v56  ;;  %v1943_v56 = vld [vmem:[%s2168_s3 + $0x10] sm:$0xff] }
 0x105   : > { %v1252_v6 = vmul.f32 %v1905_v61, %v809_v62  ;;  %v1254_v7 = vmul.f32 %v1905_v61, %v811_v63  ;;  %v654_v8 = vadd.f32 %v653_v4, %v1873_v50  ;;  %v749_v9 = vadd.f32 %v748_v5, %v1873_v50  ;;  %v655_v10 = vpop.f32.mrb[11].mxu0  ;;  %v750_v11 = vpop.f32.mrb[11].mxu1  ;;  %1641 = vmatpush1.bf16.msra.mxu0 %v1640_v48 }
 0x106   : > { %v1253_v13 = vmul.f32 %v1905_v61, %v810_v2  ;;  %v1255_v14 = vmul.f32 %v1905_v61, %v812_v3  ;;  %v656_v15 = vadd.f32 %v655_v10, %v1873_v50  ;;  %v751_v16 = vadd.f32 %v750_v11, %v1873_v50  ;;  %1649 = vmatpush1.bf16.msra.mxu1 %v1648_v49  ;;  %v1312_v2 = vpop.permute.xlu0 %1311  ;;  %v1962_v10 = vld [vmem:[%s2168_s3 + $0x18] sm:$0xff] }
 0x107   : > { %v1260_v17 = vrot.slane %v1252_v6, 4  ;;  %v1272_v18 = vrot.slane %v1254_v7, 4  ;;  %v781_v19 = vmax.f32 %v654_v8, 0.0  ;;  %v783_v20 = vmax.f32 %v749_v9, 0.0 }
 0x108   : > { %v1266_v21 = vrot.slane %v1253_v13, 4  ;;  %v1278_v22 = vrot.slane %v1255_v14, 4  ;;  %v782_v23 = vmax.f32 %v656_v15, 0.0  ;;  %v784_v25 = vmax.f32 %v751_v16, 0.0  ;;  %v659_v26 = vpop.f32.mrb[12].mxu0  ;;  %v754_v27 = vpop.f32.mrb[12].mxu1  ;;  %1590 = vmatmul.mubr.msk.f32.vlgmr.msra.gmra.mrb[20].mxu0 %vm845_vm4, %v1915_v12 }
 0x109   : > { %v1261_v28 = vadd.f32 %v1260_v17, %v1252_v6  ;;  %v1273_v29 = vadd.f32 %v1272_v18, %v1254_v7  ;;  %v660_v30 = vadd.f32 %v659_v26, %v1877_v57  ;;  %v755_v50 = vadd.f32 %v754_v27, %v1877_v57  ;;  %1594 = vmatmul.mubr.msk.f32.vlgmr.msra.gmra.mrb[20].mxu1 %vm845_vm4, %v1915_v12  ;;  %v661_v31 = vpop.f32.mrb[13].mxu0  ;;  %v756_v32 = vpop.f32.mrb[13].mxu1 }
 0x10a   : > { %v1267_v34 = vadd.f32 %v1266_v21, %v1253_v13  ;;  %v1279_v35 = vadd.f32 %v1278_v22, %v1255_v14  ;;  %v662_v36 = vadd.f32 %v661_v31, %v1877_v57  ;;  %v757_v37 = vadd.f32 %v756_v32, %v1877_v57  ;;  %928 = vmatprep.mubr.f32.mxu0 %v1711_v1 }
 0x10b   : > { %v1262_v39 = vrot.slane %v1261_v28, 2  ;;  %v1274_v40 = vrot.slane %v1273_v29, 2  ;;  %v789_v41 = vmax.f32 %v660_v30, 0.0  ;;  %v791_v43 = vmax.f32 %v755_v50, 0.0  ;;  %1017 = vmatprep.mubr.f32.mxu1 %v1711_v1 }
 0x10c   : > { %v1268_v44 = vrot.slane %v1267_v34, 2  ;;  %v1280_v45 = vrot.slane %v1279_v35, 2  ;;  %v790_v46 = vmax.f32 %v662_v36, 0.0  ;;  %v792_v47 = vmax.f32 %v757_v37, 0.0  ;;  %v665_v48 = vpop.f32.mrb[14].mxu0  ;;  %v760_v49 = vpop.f32.mrb[14].mxu1  ;;  %1591 = vmatmul.mubr.msk.f32.gmra.mrb[22].mxu0 %vm845_vm4, %v1930_v33 }
 0x10d   : > { %v1263_v51 = vadd.f32 %v1262_v39, %v1261_v28  ;;  %v1275_v52 = vadd.f32 %v1274_v40, %v1273_v29  ;;  %v1652_v57 = vpack.c.bf16 %v789_v41, %v781_v19  ;;  %v1660_v53 = vpack.c.bf16 %v791_v43, %v783_v20  ;;  %1595 = vmatmul.mubr.msk.f32.gmra.mrb[22].mxu1 %vm845_vm4, %v1930_v33  ;;  %v667_v54 = vpop.f32.mrb[15].mxu0  ;;  %v762_v55 = vpop.f32.mrb[15].mxu1 }
 0x10e   : > { %v1945_v59 = vadd.f32 %v1268_v44, %v1267_v34  ;;  %v1281_v60 = vadd.f32 %v1280_v45, %v1279_v35  ;;  %v1650_v62 = vpack.c.bf16 %v790_v46, %v782_v23  ;;  %v1658_v63 = vpack.c.bf16 %v792_v47, %v784_v25  ;;  %934 = vmatprep.mubr.f32.mxu0 %v1711_v1 }
 0x10f   : > { %v666_v3 = vadd.f32 %v665_v48, %v1879_v58  ;;  %v761_v4 = vadd.f32 %v760_v49, %v1879_v58  ;;  %v668_v5 = vadd.f32 %v667_v54, %v1879_v58  ;;  %v763_v6 = vadd.f32 %v762_v55, %v1879_v58  ;;  %1023 = vmatprep.mubr.f32.mxu1 %v1711_v1 }
 0x110   : > { %v1955_v7 = vrot.slane %v1312_v2, %v1316_v0  ;;  %v671_v8 = vpop.f32.mrb[16].mxu0  ;;  %v766_v9 = vpop.f32.mrb[16].mxu1  ;;  %1592 = vmatmul.mubr.msk.f32.gmra.mrb[24].mxu0 %vm845_vm4, %v1943_v56  ;;  %1651 = vmatprep.subr.bf16.mxu0 %v1650_v62  ;;  %v1276_v11 = vrot.slane %v1275_v52, 1  ;;  %v1282_v13 = vrot.slane %v1281_v60, 1  ;;  %v1264_v58 = vrot.slane %v1263_v51, 1 }
 0x111   : > { %v797_v14 = vmax.f32 %v666_v3, 0.0  ;;  %v799_v15 = vmax.f32 %v761_v4, 0.0  ;;  %v798_v16 = vmax.f32 %v668_v5, 0.0  ;;  %1596 = vmatmul.mubr.msk.f32.gmra.mrb[24].mxu1 %vm845_vm4, %v1943_v56  ;;  %1659 = vmatprep.subr.bf16.mxu1 %v1658_v63  ;;  %v673_v42 = vpop.f32.mrb[17].mxu0  ;;  %v768_v0 = vpop.f32.mrb[17].mxu1  ;;  %v1270_v17 = vrot.slane %v1945_v59, 1 }
 0x112   : > { %v672_v18 = vadd.f32 %v671_v8, %v1889_v24  ;;  %v767_v19 = vadd.f32 %v766_v9, %v1889_v24  ;;  %v674_v20 = vadd.f32 %v673_v42, %v1889_v24  ;;  %v769_v21 = vadd.f32 %v768_v0, %v1889_v24  ;;  %1653 = vmatpush1.bf16.msra.mxu0 %v1652_v57 }
 0x113   : > { %v800_v22 = vmax.f32 %v763_v6, 0.0  ;;  %1661 = vmatpush1.bf16.msra.mxu1 %v1660_v53  ;;  %940 = vmatprep.mubr.f32.mxu0 %v1711_v1  ;;  %v1277_v23 = vadd.f32 %v1276_v11, %v1275_v52  ;;  %v1283_v25 = vadd.f32 %v1282_v13, %v1281_v60  ;;  %v1265_v26 = vadd.f32 %v1264_v58, %v1263_v51 }
 0x114   : > { %v805_v27 = vmax.f32 %v672_v18, 0.0  ;;  %v807_v28 = vmax.f32 %v767_v19, 0.0  ;;  %v806_v29 = vmax.f32 %v674_v20, 0.0  ;;  %v808_v30 = vmax.f32 %v769_v21, 0.0  ;;  %1029 = vmatprep.mubr.f32.mxu1 %v1711_v1  ;;  %v677_v50 = vpop.f32.mrb[18].mxu0  ;;  %v772_v31 = vpop.f32.mrb[18].mxu1  ;;  %1593 = vmatmul.mubr.msk.f32.gmra.mrb[26].mxu0 %vm845_vm4, %v1962_v10 }
 0x115   : > { %v678_v24 = vadd.f32 %v677_v50, %v1897_v38  ;;  %v773_v32 = vadd.f32 %v772_v31, %v1897_v38  ;;  %1597 = vmatmul.mubr.msk.f32.gmra.mrb[26].mxu1 %vm845_vm4, %v1962_v10  ;;  %v679_v34 = vpop.f32.mrb[19].mxu0  ;;  %v774_v35 = vpop.f32.mrb[19].mxu1  ;;  %v1980_v36 = vadd.f32 %v1955_v7, %v1277_v23  ;;  %v1983_v37 = vadd.f32 %v1955_v7, %v1283_v25 }
 0x116   : > { %v1656_v39 = vpack.c.bf16 %v805_v27, %v797_v14  ;;  %v1664_v40 = vpack.c.bf16 %v807_v28, %v799_v15  ;;  %v1654_v41 = vpack.c.bf16 %v806_v29, %v798_v16  ;;  %v1662_v43 = vpack.c.bf16 %v808_v30, %v800_v22  ;;  %1100 = vmatprep.mubr.f32.mxu0 %v1711_v1  ;;  %v824_v27 = vld [vmem:[%s2169_s4 + $0x18] sm:$0xff]  ;;  %v2036_v28 = vpop.permute.xlu0 %827 }
 0x117   : > { %v813_v44 = vmax.f32 %v678_v24, 0.0  ;;  %v815_v45 = vmax.f32 %v773_v32, 0.0  ;;  %v680_v46 = vadd.f32 %v679_v34, %v1897_v38  ;;  %v775_v47 = vadd.f32 %v774_v35, %v1897_v38  ;;  %1189 = vmatprep.mubr.f32.mxu1 %v1711_v1 }
 0x118   : > { %v1364_v48 = vmax.f32 %v1980_v36, %v1983_v37  ;;  %1663 = vmatprep.subr.bf16.mxu1 %v1662_v43  ;;  %v1271_v49 = vadd.f32 %v1270_v17, %v1945_v59  ;;  %v1993_v51 = vadd.f32 %v1955_v7, %v1265_v26  ;;  %1655 = vmatprep.subr.bf16.mxu0 %v1654_v41  ;;  %v823_v26 = vld [vmem:[%s2169_s4 + $0x10] sm:$0xff] }
 0x119   : > { %v1256_v52 = vmul.f32 %v1905_v61, %v813_v44  ;;  %v1258_v57 = vmul.f32 %v1905_v61, %v815_v45  ;;  %v814_v53 = vmax.f32 %v680_v46, 0.0  ;;  %v816_v54 = vmax.f32 %v775_v47, 0.0  ;;  %1657 = vmatpush1.bf16.msra.mxu0 %v1656_v39  ;;  %1665 = vmatpush1.bf16.msra.mxu1 %v1664_v40 }
 0x11a   : > { %1365 = vmax.xlane.f32.xlu0 %v1364_v48  ;;  %v1998_v38 = vadd.f32 %v1955_v7, %v1271_v49 }
 0x11b   : > { %v1284_v55 = vrot.slane %v1256_v52, 4  ;;  %v1296_v60 = vrot.slane %v1258_v57, 4  ;;  %v1257_v59 = vmul.f32 %v1905_v61, %v814_v53  ;;  %v1259_v62 = vmul.f32 %v1905_v61, %v816_v54 }
 0x11c   : > { %v1326_v63 = vmax.f32 %v1993_v51, %v1998_v38  ;;  %1598 = vmatmul.mubr.msk.f32.vlgmr.msra.gmra.mrb[28].mxu0 %vm845_vm4, %v1915_v12  ;;  %1602 = vmatmul.mubr.msk.f32.vlgmr.msra.gmra.mrb[28].mxu1 %vm845_vm4, %v1915_v12 }
 0x11d   : > { %v1285_v2 = vadd.f32 %v1284_v55, %v1256_v52  ;;  %v1297_v3 = vadd.f32 %v1296_v60, %v1258_v57  ;;  %v1290_v4 = vrot.slane %v1257_v59, 4  ;;  %v1302_v5 = vrot.slane %v1259_v62, 4  ;;  %1106 = vmatprep.mubr.f32.mxu0 %v1711_v1  ;;  %1195 = vmatprep.mubr.f32.mxu1 %v1711_v1 }
 0x11e   : > { %1327 = vmax.xlane.f32.xlu1 %v1326_v63 }
 0x11f   : > { %v1286_v6 = vrot.slane %v1285_v2, 2  ;;  %v1298_v61 = vrot.slane %v1297_v3, 2  ;;  %v1291_v8 = vadd.f32 %v1290_v4, %v1257_v59  ;;  %v1303_v9 = vadd.f32 %v1302_v5, %v1259_v62 }
 0x120   : > { %1599 = vmatmul.mubr.msk.f32.gmra.mrb[30].mxu0 %vm845_vm4, %v1930_v33  ;;  %1603 = vmatmul.mubr.msk.f32.gmra.mrb[30].mxu1 %vm845_vm4, %v1930_v33 }
 0x121   : > { %v1287_v12 = vadd.f32 %v1286_v6, %v1285_v2  ;;  %v1299_v11 = vadd.f32 %v1298_v61, %v1297_v3  ;;  %v1292_v13 = vrot.slane %v1291_v8, 2  ;;  %v1304_v58 = vrot.slane %v1303_v9, 2  ;;  %1112 = vmatprep.mubr.f32.mxu0 %v1711_v1  ;;  %1201 = vmatprep.mubr.f32.mxu1 %v1711_v1 }
 0x123   : > { %v1293_v14 = vadd.f32 %v1292_v13, %v1291_v8  ;;  %v1305_v15 = vadd.f32 %v1304_v58, %v1303_v9  ;;  %v1288_v16 = vrot.slane %v1287_v12, 1  ;;  %v1300_v42 = vrot.slane %v1299_v11, 1 }
 0x124   : > { %1600 = vmatmul.mubr.msk.f32.gmra.mrb[32].mxu0 %vm845_vm4, %v1943_v56  ;;  %1604 = vmatmul.mubr.msk.f32.gmra.mrb[32].mxu1 %vm845_vm4, %v1943_v56 }
 0x125   : > { %1118 = vmatprep.mubr.f32.mxu0 %v1711_v1  ;;  %1207 = vmatprep.mubr.f32.mxu1 %v1711_v1  ;;  %v1289_v33 = vadd.f32 %v1288_v16, %v1287_v12  ;;  %v1294_v0 = vrot.slane %v1293_v14, 1  ;;  %v1301_v17 = vadd.f32 %v1300_v42, %v1299_v11  ;;  %v1306_v18 = vrot.slane %v1305_v15, 1 }
 0x127   : > { %v1295_v19 = vadd.f32 %v1294_v0, %v1293_v14  ;;  %v1322_v20 = vadd.f32 %v1955_v7, %v1289_v33  ;;  %v1307_v21 = vadd.f32 %v1306_v18, %v1305_v15  ;;  %v1324_v22 = vadd.f32 %v1955_v7, %v1301_v17 }
 0x128   : > { %1601 = vmatmul.mubr.msk.f32.gmra.mrb[34].mxu0 %vm845_vm4, %v1962_v10  ;;  %1605 = vmatmul.mubr.msk.f32.gmra.mrb[34].mxu1 %vm845_vm4, %v1962_v10  ;;  %v2038_v10 = vpop.permute.xlu1 %832 }
 0x129   : > { %v1323_v56 = vadd.f32 %v1955_v7, %v1295_v19  ;;  %v1325_v1 = vadd.f32 %v1955_v7, %v1307_v21 }
 0x12b   : > { %v1402_v23 = vmax.f32 %v1322_v20, %v1323_v56  ;;  %v1440_v25 = vmax.f32 %v1324_v22, %v1325_v1 }
 0x12d   : > { %1403 = vmax.xlane.f32.xlu0 %v1402_v23  ;;  %1441 = vmax.xlane.f32.xlu1 %v1440_v25 }
 0x13e   : > { %837 = vperm.xlu1 %1678, %v823_v26  }
 0x143   : > { %842 = vperm.xlu0 %1677, %v824_v27  }
 0x1a7   : > { %v1366_v29 = vpop.xlane.xlu0 %1365 }
 0x1a8   : > { %v1367_v7 = vsub.f32 %v1980_v36, %v1366_v29  ;;  %v1368_v30 = vsub.f32 %v1983_v37, %v1366_v29 }
 0x1aa   : > { %v1369_v50 = vmul.f32 1.442695, %v1367_v7  ;;  %v1371_v31 = vmul.f32 1.442695, %v1368_v30 }
 0x1ab   : > { %v1328_v24 = vpop.xlane.xlu1 %1327 }
 0x1ac   : > { %1679 = vpow2.f32 %v1369_v50  ;;  %v1329_v32 = vsub.f32 %v1993_v51, %v1328_v24  ;;  %v1330_v34 = vsub.f32 %v1998_v38, %v1328_v24 }
 0x1ad   : > { %1681 = vpow2.f32 %v1371_v31 }
 0x1ae   : > { %v1331_v35 = vmul.f32 1.442695, %v1329_v32  ;;  %v1333_v39 = vmul.f32 1.442695, %v1330_v34 }
 0x1b0   : > { %1683 = vpow2.f32 %v1331_v35 }
 0x1b1   : > { %1685 = vpow2.f32 %v1333_v39 }
 0x1b6   : > { %v2044_v40 = vpop.eup %1679 }
 0x1b7   : > { %v2046_v41 = vpop.eup %1681 }
 0x1b8   : > { %v1373_v36 = vadd.f32 %v2046_v41, %v2044_v40 }
 0x1ba   : > { %v2050_v37 = vpop.eup %1683  ;;  %1374 = vadd.xlane.f32.xlu0 %v1373_v36  ;;  %v1404_v43 = vpop.xlane.xlu0 %1403 }
 0x1bb   : > { %v1442_v44 = vpop.xlane.xlu1 %1441  ;;  %v2052_v45 = vpop.eup %1685  ;;  %v1405_v46 = vsub.f32 %v1322_v20, %v1404_v43  ;;  %v1406_v47 = vsub.f32 %v1323_v56, %v1404_v43 }
 0x1bc   : > { %v1443_v48 = vsub.f32 %v1324_v22, %v1442_v44  ;;  %v1444_v49 = vsub.f32 %v1325_v1, %v1442_v44  ;;  %v1335_v51 = vadd.f32 %v2052_v45, %v2050_v37 }
 0x1bd   : > { %v1407_v52 = vmul.f32 1.442695, %v1405_v46  ;;  %v1409_v57 = vmul.f32 1.442695, %v1406_v47 }
 0x1be   : > { %v1445_v53 = vmul.f32 1.442695, %v1443_v48  ;;  %1336 = vadd.xlane.f32.xlu1 %v1335_v51  ;;  %v1447_v54 = vmul.f32 1.442695, %v1444_v49 }
 0x1bf   : > { %1687 = vpow2.f32 %v1407_v52  ;;  %v2080_v1 = vpop.permute.xlu1 %837 }
 0x1c0   : > { %1689 = vpow2.f32 %v1409_v57 }
 0x1c1   : > { %1691 = vpow2.f32 %v1445_v53 }
 0x1c2   : > { %1693 = vpow2.f32 %v1447_v54  ;;  %v2090_v47 = vpop.permute.xlu0 %842 }
 0x1c9   : > { %v2056_v38 = vpop.eup %1687 }
 0x1ca   : > { %v2058_v55 = vpop.eup %1689 }
 0x1cb   : > { %v2060_v60 = vpop.eup %1691  ;;  %v1411_v59 = vadd.f32 %v2058_v55, %v2056_v38 }
 0x1cc   : > { %v2064_v62 = vpop.eup %1693 }
 0x1cd   : > { %1412 = vadd.xlane.f32.xlu0 %v1411_v59  ;;  %v1449_v63 = vadd.f32 %v2064_v62, %v2060_v60 }
 0x1cf   : > { %1450 = vadd.xlane.f32.xlu1 %v1449_v63 }
 0x1db   : > { %v924_v2 = vpop.f32.mrb[20].mxu0 }
 0x1dc   : > { %v925_v3 = vadd.f32 %v924_v2, %v2036_v28  ;;  %v1013_v4 = vpop.f32.mrb[20].mxu1  ;;  %v926_v5 = vpop.f32.mrb[21].mxu0 }
 0x1dd   : > { %v1014_v6 = vadd.f32 %v1013_v4, %v2036_v28  ;;  %v927_v61 = vadd.f32 %v926_v5, %v2036_v28  ;;  %v1015_v8 = vpop.f32.mrb[21].mxu1 }
 0x1de   : > { %v1214_v9 = vmax.f32 %v925_v3, 0.0  ;;  %v1016_v12 = vadd.f32 %v1015_v8, %v2036_v28 }
 0x1df   : > { %v1216_v11 = vmax.f32 %v1014_v6, 0.0  ;;  %v1215_v13 = vmax.f32 %v927_v61, 0.0  ;;  %v930_v58 = vpop.f32.mrb[22].mxu0 }
 0x1e0   : > { %v1338_v14 = vmul.f32 %v2050_v37, %v1214_v9  ;;  %v1217_v15 = vmax.f32 %v1016_v12, 0.0  ;;  %v931_v16 = vadd.f32 %v930_v58, %v2038_v10  ;;  %v1019_v42 = vpop.f32.mrb[22].mxu1  ;;  %v932_v33 = vpop.f32.mrb[23].mxu0 }
 0x1e1   : > { %v1376_v0 = vmul.f32 %v2044_v40, %v1216_v11  ;;  %v1339_v17 = vmul.f32 %v2052_v45, %v1215_v13  ;;  %v1020_v18 = vadd.f32 %v1019_v42, %v2038_v10  ;;  %v933_v19 = vadd.f32 %v932_v33, %v2038_v10  ;;  %v1021_v20 = vpop.f32.mrb[23].mxu1 }
 0x1e2   : > { %v1377_v21 = vmul.f32 %v2046_v41, %v1217_v15  ;;  %v1222_v22 = vmax.f32 %v931_v16, 0.0  ;;  %v1022_v56 = vadd.f32 %v1021_v20, %v2038_v10 }
 0x1e3   : > { %v1224_v23 = vmax.f32 %v1020_v18, 0.0  ;;  %v1223_v25 = vmax.f32 %v933_v19, 0.0  ;;  %v936_v26 = vpop.f32.mrb[24].mxu0  ;;  %v1346_v27 = vadd.f32 %v1339_v17, %v1338_v14 }
 0x1e4   : > { %v1340_v29 = vmul.f32 %v2050_v37, %v1222_v22  ;;  %v1225_v7 = vmax.f32 %v1022_v56, 0.0  ;;  %v937_v30 = vadd.f32 %v936_v26, %v2080_v1  ;;  %v1025_v50 = vpop.f32.mrb[24].mxu1  ;;  %v938_v31 = vpop.f32.mrb[25].mxu0  ;;  %v1384_v24 = vadd.f32 %v1377_v21, %v1376_v0 }
 0x1e5   : > { %v1378_v32 = vmul.f32 %v2044_v40, %v1224_v23  ;;  %v1341_v34 = vmul.f32 %v2052_v45, %v1223_v25  ;;  %v1026_v35 = vadd.f32 %v1025_v50, %v2080_v1  ;;  %v939_v39 = vadd.f32 %v938_v31, %v2080_v1  ;;  %v1027_v36 = vpop.f32.mrb[25].mxu1  ;;  %1347 = vadd.xlane.f32.xlu0 %v1346_v27 }
 0x1e6   : > { %v1379_v43 = vmul.f32 %v2046_v41, %v1225_v7  ;;  %v1230_v44 = vmax.f32 %v937_v30, 0.0  ;;  %v1028_v46 = vadd.f32 %v1027_v36, %v2080_v1 }
 0x1e7   : > { %v1232_v48 = vmax.f32 %v1026_v35, 0.0  ;;  %v1231_v49 = vmax.f32 %v939_v39, 0.0  ;;  %v942_v51 = vpop.f32.mrb[26].mxu0  ;;  %v1349_v52 = vadd.f32 %v1341_v34, %v1340_v29 }
 0x1e8   : > { %v1342_v57 = vmul.f32 %v2050_v37, %v1230_v44  ;;  %v1233_v53 = vmax.f32 %v1028_v46, 0.0  ;;  %v943_v54 = vadd.f32 %v942_v51, %v2090_v47  ;;  %v1031_v59 = vpop.f32.mrb[26].mxu1  ;;  %v944_v63 = vpop.f32.mrb[27].mxu0  ;;  %v1387_v2 = vadd.f32 %v1379_v43, %v1378_v32 }
 0x1e9   : > { %v1380_v3 = vmul.f32 %v2044_v40, %v1232_v48  ;;  %v1343_v4 = vmul.f32 %v2052_v45, %v1231_v49  ;;  %v1032_v5 = vadd.f32 %v1031_v59, %v2090_v47  ;;  %v945_v6 = vadd.f32 %v944_v63, %v2090_v47  ;;  %v1033_v61 = vpop.f32.mrb[27].mxu1  ;;  %1350 = vadd.xlane.f32.xlu1 %v1349_v52 }
 0x1ea   : > { %v1381_v8 = vmul.f32 %v2046_v41, %v1233_v53  ;;  %v1238_v9 = vmax.f32 %v943_v54, 0.0  ;;  %v1034_v12 = vadd.f32 %v1033_v61, %v2090_v47  ;;  %1385 = vadd.xlane.f32.xlu0 %v1384_v24 }
 0x1eb   : > { %v1240_v11 = vmax.f32 %v1032_v5, 0.0  ;;  %v1239_v13 = vmax.f32 %v945_v6, 0.0  ;;  %v1352_v58 = vadd.f32 %v1343_v4, %v1342_v57 }
 0x1ec   : > { %v1344_v14 = vmul.f32 %v2050_v37, %v1238_v9  ;;  %v1241_v15 = vmax.f32 %v1034_v12, 0.0  ;;  %v1390_v16 = vadd.f32 %v1381_v8, %v1380_v3 }
 0x1ed   : > { %v1382_v42 = vmul.f32 %v2044_v40, %v1240_v11  ;;  %v1345_v33 = vmul.f32 %v2052_v45, %v1239_v13  ;;  %1388 = vadd.xlane.f32.xlu1 %v1387_v2 }
 0x1ee   : > { %v1383_v0 = vmul.f32 %v2046_v41, %v1241_v15  ;;  %1353 = vadd.xlane.f32.xlu0 %v1352_v58 }
 0x1ef   : > { %v1102_v17 = vpop.f32.mrb[28].mxu0  ;;  %v1191_v18 = vpop.f32.mrb[28].mxu1  ;;  %v1355_v19 = vadd.f32 %v1345_v33, %v1344_v14 }
 0x1f0   : > { %v1103_v20 = vadd.f32 %v1102_v17, %v2036_v28  ;;  %v1192_v21 = vadd.f32 %v1191_v18, %v2036_v28  ;;  %v1104_v22 = vpop.f32.mrb[29].mxu0  ;;  %v1193_v56 = vpop.f32.mrb[29].mxu1  ;;  %v1393_v37 = vadd.f32 %v1383_v0, %v1382_v42 }
 0x1f1   : > { %v1105_v23 = vadd.f32 %v1104_v22, %v2036_v28  ;;  %v1194_v40 = vadd.f32 %v1193_v56, %v2036_v28  ;;  %1356 = vadd.xlane.f32.xlu1 %v1355_v19 }
 0x1f2   : > { %v1218_v45 = vmax.f32 %v1103_v20, 0.0  ;;  %v1220_v25 = vmax.f32 %v1192_v21, 0.0  ;;  %1391 = vadd.xlane.f32.xlu0 %v1390_v16 }
 0x1f3   : > { %v1219_v41 = vmax.f32 %v1105_v23, 0.0  ;;  %v1221_v26 = vmax.f32 %v1194_v40, 0.0  ;;  %v1108_v27 = vpop.f32.mrb[30].mxu0  ;;  %v1197_v29 = vpop.f32.mrb[30].mxu1 }
 0x1f4   : > { %v1414_v7 = vmul.f32 %v2056_v38, %v1218_v45  ;;  %v1452_v30 = vmul.f32 %v2060_v60, %v1220_v25  ;;  %v1109_v50 = vadd.f32 %v1108_v27, %v2038_v10  ;;  %v1198_v31 = vadd.f32 %v1197_v29, %v2038_v10  ;;  %v1110_v24 = vpop.f32.mrb[31].mxu0  ;;  %v1199_v32 = vpop.f32.mrb[31].mxu1 }
 0x1f5   : > { %v1415_v28 = vmul.f32 %v2058_v55, %v1219_v41  ;;  %v1453_v34 = vmul.f32 %v2064_v62, %v1221_v26  ;;  %v1111_v35 = vadd.f32 %v1110_v24, %v2038_v10  ;;  %v1200_v39 = vadd.f32 %v1199_v32, %v2038_v10  ;;  %1394 = vadd.xlane.f32.xlu1 %v1393_v37 }
 0x1f6   : > { %v1226_v36 = vmax.f32 %v1109_v50, 0.0  ;;  %v1228_v43 = vmax.f32 %v1198_v31, 0.0 }
 0x1f7   : > { %v1227_v44 = vmax.f32 %v1111_v35, 0.0  ;;  %v1229_v46 = vmax.f32 %v1200_v39, 0.0  ;;  %v1114_v48 = vpop.f32.mrb[32].mxu0  ;;  %v1203_v49 = vpop.f32.mrb[32].mxu1  ;;  %v1422_v51 = vadd.f32 %v1415_v28, %v1414_v7  ;;  %v1460_v52 = vadd.f32 %v1453_v34, %v1452_v30 }
 0x1f8   : > { %v1416_v57 = vmul.f32 %v2056_v38, %v1226_v36  ;;  %v1454_v53 = vmul.f32 %v2060_v60, %v1228_v43  ;;  %v1115_v54 = vadd.f32 %v1114_v48, %v2080_v1  ;;  %v1204_v59 = vadd.f32 %v1203_v49, %v2080_v1  ;;  %v1116_v63 = vpop.f32.mrb[33].mxu0  ;;  %v1205_v2 = vpop.f32.mrb[33].mxu1 }
 0x1f9   : > { %v1417_v10 = vmul.f32 %v2058_v55, %v1227_v44  ;;  %v1455_v3 = vmul.f32 %v2064_v62, %v1229_v46  ;;  %v1117_v4 = vadd.f32 %v1116_v63, %v2080_v1  ;;  %v1206_v5 = vadd.f32 %v1205_v2, %v2080_v1  ;;  %1423 = vadd.xlane.f32.xlu0 %v1422_v51 }
 0x1fa   : > { %v1234_v6 = vmax.f32 %v1115_v54, 0.0  ;;  %v1236_v61 = vmax.f32 %v1204_v59, 0.0 }
 0x1fb   : > { %v1235_v8 = vmax.f32 %v1117_v4, 0.0  ;;  %v1237_v9 = vmax.f32 %v1206_v5, 0.0  ;;  %v1120_v12 = vpop.f32.mrb[34].mxu0  ;;  %v1209_v11 = vpop.f32.mrb[34].mxu1  ;;  %v1425_v13 = vadd.f32 %v1417_v10, %v1416_v57  ;;  %v1463_v58 = vadd.f32 %v1455_v3, %v1454_v53 }
 0x1fc   : > { %v1418_v14 = vmul.f32 %v2056_v38, %v1234_v6  ;;  %v1456_v15 = vmul.f32 %v2060_v60, %v1236_v61  ;;  %v1121_v16 = vadd.f32 %v1120_v12, %v2090_v47  ;;  %v1210_v42 = vadd.f32 %v1209_v11, %v2090_v47  ;;  %v1122_v33 = vpop.f32.mrb[35].mxu0  ;;  %v1211_v0 = vpop.f32.mrb[35].mxu1 }
 0x1fd   : > { %v1419_v1 = vmul.f32 %v2058_v55, %v1235_v8  ;;  %v1457_v17 = vmul.f32 %v2064_v62, %v1237_v9  ;;  %v1123_v18 = vadd.f32 %v1122_v33, %v2090_v47  ;;  %v1212_v19 = vadd.f32 %v1211_v0, %v2090_v47  ;;  %1426 = vadd.xlane.f32.xlu1 %v1425_v13 }
 0x1fe   : > { %v1242_v20 = vmax.f32 %v1121_v16, 0.0  ;;  %v1244_v21 = vmax.f32 %v1210_v42, 0.0  ;;  %1461 = vadd.xlane.f32.xlu0 %v1460_v52 }
 0x1ff   : > { %v1243_v22 = vmax.f32 %v1123_v18, 0.0  ;;  %v1245_v56 = vmax.f32 %v1212_v19, 0.0  ;;  %v1428_v37 = vadd.f32 %v1419_v1, %v1418_v14  ;;  %v1466_v23 = vadd.f32 %v1457_v17, %v1456_v15 }
 0x200   : > { %v1420_v40 = vmul.f32 %v2056_v38, %v1242_v20  ;;  %v1458_v45 = vmul.f32 %v2060_v60, %v1244_v21 }
 0x201   : > { %v1421_v25 = vmul.f32 %v2058_v55, %v1243_v22  ;;  %v1459_v41 = vmul.f32 %v2064_v62, %v1245_v56  ;;  %1464 = vadd.xlane.f32.xlu1 %v1463_v58 }
 0x202   : > { %1429 = vadd.xlane.f32.xlu0 %v1428_v37 }
 0x203   : > { %v1431_v26 = vadd.f32 %v1421_v25, %v1420_v40  ;;  %v1469_v47 = vadd.f32 %v1459_v41, %v1458_v45 }
 0x205   : > { %1432 = vadd.xlane.f32.xlu1 %v1431_v26 }
 0x206   : > { %1467 = vadd.xlane.f32.xlu0 %v1466_v23 }
 0x209   : > { %1470 = vadd.xlane.f32.xlu1 %v1469_v47 }
 0x247   : > { %v1375_v27 = vpop.xlane.xlu0 %1374 }
 0x248   : > { %v1396_v24 = vmul.f32 256.0, %v1375_v27 }
 0x24a   : > { %1695 = vrcp.f32 %v1396_v24 }
 0x24b   : > { %v1337_v29 = vpop.xlane.xlu1 %1336 }
 0x24c   : > { %v1358_v55 = vmul.f32 256.0, %v1337_v29 }
 0x254   : > { %v1696_v43 = vpop.eup %1695 }
 0x25a   : > { %v1413_v7 = vpop.xlane.xlu0 %1412 }
 0x25b   : > { %v1434_v60 = vmul.f32 256.0, %v1413_v7 }
 0x25c   : > { %v1451_v30 = vpop.xlane.xlu1 %1450 }
 0x25d   : > { %v1472_v62 = vmul.f32 256.0, %v1451_v30  ;;  %1697 = vrcp.f32 %v1434_v60 }
 0x25e   : > { %1699 = vrcp.f32 %v1358_v55 }
 0x25f   : > { %1701 = vrcp.f32 %v1472_v62 }
 0x267   : > { %v1698_v44 = vpop.eup %1697 }
 0x268   : > { %v1700_v48 = vpop.eup %1699 }
 0x269   : > { %v1702_v57 = vpop.eup %1701 }
 0x272   : > { %v1348_v50 = vpop.xlane.xlu0 %1347 }
 0x273   : > { %v1360_v51 = vmul.f32 %v1700_v48, %v1348_v50 }
 0x276   : > { %v1351_v31 = vpop.xlane.xlu1 %1350 }
 0x277   : > { %v1386_v38 = vpop.xlane.xlu0 %1385  ;;  %v1361_v10 = vmul.f32 %v1700_v48, %v1351_v31 }
 0x278   : > { %v1398_v46 = vmul.f32 %v1696_v43, %v1386_v38 }
 0x27a   : > { %v1389_v32 = vpop.xlane.xlu1 %1388  ;;  %v1479_v59 = vsel %vm1478_vm5, %v1360_v51, %v1398_v46 }
 0x27b   : > { %v1354_v28 = vpop.xlane.xlu0 %1353  ;;  %v1399_v53 = vmul.f32 %v1696_v43, %v1389_v32 }
 0x27c   : > { %v1362_v58 = vmul.f32 %v1700_v48, %v1354_v28 }
 0x27d   : > { %v1480_v6 = vsel %vm1478_vm5, %v1361_v10, %v1399_v53 }
 0x27e   : > { %v1357_v34 = vpop.xlane.xlu1 %1356 }
 0x27f   : > { %v1392_v35 = vpop.xlane.xlu0 %1391  ;;  %v1363_v1 = vmul.f32 %v1700_v48, %v1357_v34 }
 0x280   : > { %v1400_v9 = vmul.f32 %v1696_v43, %v1392_v35 }
 0x282   : > { %v1395_v39 = vpop.xlane.xlu1 %1394  ;;  %v1481_v42 = vsel %vm1478_vm5, %v1362_v58, %v1400_v9 }
 0x283   : > { %v1401_v15 = vmul.f32 %v1696_v43, %v1395_v39 }
 0x285   : > { %v1482_v20 = vsel %vm1478_vm5, %v1363_v1, %v1401_v15 }
 0x286   : > { %v1424_v36 = vpop.xlane.xlu0 %1423 }
 0x287   : > { %v1436_v49 = vmul.f32 %v1698_v44, %v1424_v36 }
 0x289   : > { %v1484_v3 = vsel %vm1483_vm6, %v1479_v59, %v1436_v49 }
 0x28a   : > { %v1427_v52 = vpop.xlane.xlu1 %1426 }
 0x28b   : > { %v1462_v54 = vpop.xlane.xlu0 %1461  ;;  %v1437_v63 = vmul.f32 %v1698_v44, %v1427_v52 }
 0x28c   : > { %v1474_v2 = vmul.f32 %v1702_v57, %v1462_v54 }
 0x28d   : > { %v1485_v12 = vsel %vm1483_vm6, %v1480_v6, %v1437_v63 }
 0x28e   : > { %v1489_v4 = vsel %vm1488_vm7, %v1484_v3, %v1474_v2  ;;  %v1465_v5 = vpop.xlane.xlu1 %1464 }
 0x28f   : > { %1494 = vst.msk [vmem:[%s2141_s28] sm:$0xff] %vm1493_vm8, %v1489_v4  ;;  %v1475_v61 = vmul.f32 %v1702_v57, %v1465_v5  ;;  %v1430_v8 = vpop.xlane.xlu0 %1429 }
 0x290   : > { %v1438_v13 = vmul.f32 %v1698_v44, %v1430_v8 }
 0x291   : > { %v1490_v11 = vsel %vm1488_vm7, %v1485_v12, %v1475_v61 }
 0x292   : > { %1495 = vst.msk [vmem:[%s2141_s28 + $0x8] sm:$0xff] %vm1493_vm8, %v1490_v11  ;;  %v1433_v14 = vpop.xlane.xlu1 %1432  ;;  %v1486_v17 = vsel %vm1483_vm6, %v1481_v42, %v1438_v13 }
 0x293   : > { %v1468_v16 = vpop.xlane.xlu0 %1467  ;;  %v1439_v33 = vmul.f32 %v1698_v44, %v1433_v14 }
 0x294   : > { %v1476_v0 = vmul.f32 %v1702_v57, %v1468_v16 }
 0x295   : > { %v1487_v22 = vsel %vm1483_vm6, %v1482_v20, %v1439_v33 }
 0x296   : > { %v1491_v18 = vsel %vm1488_vm7, %v1486_v17, %v1476_v0  ;;  %v1471_v19 = vpop.xlane.xlu1 %1470 }
 0x297   : > { %1496 = vst.msk [vmem:[%s2141_s28 + $0x10] sm:$0xff] %vm1493_vm8, %v1491_v18  ;;  %v1477_v21 = vmul.f32 %v1702_v57, %v1471_v19 }
 0x299   : > { %v1492_v56 = vsel %vm1488_vm7, %v1487_v22, %v1477_v21 }
 0x29a   : > { %1497 = vst.msk [vmem:[%s2141_s28 + $0x18] sm:$0xff] %vm1493_vm8, %v1492_v56 }
 0x29b PF: > { %s19_s26 = sadd.s32 1, %s1709_s26  }
 0x29c   : > { %p16_p4 = scmp.ge.s32.totalorder %s19_s26, 4  }
 0x29e   :  { %18 = sbr.rel (!%p16_p4) target bundleno = 3 (0x3), region = 78 }

</bundles_post_ra>
